<compile_context>
chip_gen: v7x
topology: tpu7x:2x2x1
jax: 0.10.0
libtpu: 0.0.40
codegen_flags: <defaults>
</compile_context>

<pallas_src>
import jax
import jax.numpy as jnp
import numpy as np
from jax.experimental import pallas as pl

# ----------------------------- config ---------------------------------------
nChannel = 3      # (t, x, y) coordinates in the PINN usage
nFeat = 16
nDenselayer = 3
growthRate = 8
scale = 2
B = 16            # batch (single grid step handles all of it)


# --------------------------- Pallas kernel ----------------------------------
def make_rdn_kernel(wspecs, bias_widths):
    """wspecs: list of (row_offset, K, N) static slices into the weight slab,
    in exact consumption order.  bias_widths: valid lane width per bias row."""

    def kernel(x_ref, w_ref, b_ref, out_ref):
        it = iter(wspecs)                       # fresh per trace

        def mm(h):
            off, K, N = next(it)
            return jnp.dot(h, w_ref[off:off + K, 0:N],
                           preferred_element_type=jnp.float32)

        def bias(row):
            return b_ref[row:row + 1, 0:bias_widths[row]]   # (1, N) broadcast

        x = x_ref[...].astype(jnp.float32)

        # conv1 / conv2 (3x3 on 1x1 spatial == center-tap linear)
        F_ = mm(x) + bias(0)
        F_0 = mm(F_) + bias(1)

        # Residual dense block with concat-free (weight-split) dense layers.
        def rdb(h0):
            pieces = [h0]
            for l in range(nDenselayer):
                acc = mm(pieces[0])
                for m in range(1, l + 1):
                    acc = acc + mm(pieces[m])
                pieces.append(jnp.maximum(acc, 0.0))        # conv + relu
            acc = mm(pieces[0])                              # 1x1 conv (split)
            for m in range(1, nDenselayer + 1):
                acc = acc + mm(pieces[m])
            return acc + h0                                  # residual

        F_1 = rdb(F_0)
        F_2 = rdb(F_1)
        F_3 = rdb(F_2)

        # GFF_1x1 over concat([F_1,F_2,F_3]) as three split matmuls
        FdLF = mm(F_1) + mm(F_2) + mm(F_3) + bias(2)
        FGF = mm(FdLF) + bias(3)                             # GFF_3x3
        FDF = FGF + F_

        # conv_up + PixelShuffle + conv3 folded: one matmul, one store
        out = mm(FDF) + bias(4)                              # (B, r*r*nChannel)
        out_ref[...] = out.astype(out_ref.dtype)

        leftover = list(it)
        assert not leftover, f"unconsumed weight blocks: {len(leftover)}"

    return kernel


# --------------------------- parameter setup --------------------------------
class KeyGen:
    def __init__(self, key):
        self.key = key
        self.i = 0

    def __call__(self, shape, scale=0.1):
        self.i += 1
        return scale * jax.random.normal(
            jax.random.fold_in(self.key, self.i), shape, jnp.float32)


def init_params(key):
    kg = KeyGen(key)
    P = {}
    P["conv1_w"] = kg((nFeat, nChannel, 3, 3)); P["conv1_b"] = kg((nFeat,))
    P["conv2_w"] = kg((nFeat, nFeat, 3, 3));    P["conv2_b"] = kg((nFeat,))
    for k in range(3):
        dws = []
        c = nFeat
        for _ in range(nDenselayer):
            dws.append(kg((growthRate, c, 3, 3)))
            c += growthRate
        P[f"rdb{k}_dense"] = dws
        P[f"rdb{k}_1x1"] = kg((nFeat, c, 1, 1))
    P["gff1_w"] = kg((nFeat, 3 * nFeat, 1, 1)); P["gff1_b"] = kg((nFeat,))
    P["gff3_w"] = kg((nFeat, nFeat, 3, 3));     P["gff3_b"] = kg((nFeat,))
    P["up_w"] = kg((nFeat * scale * scale, nFeat, 3, 3))
    P["up_b"] = kg((nFeat * scale * scale,))
    P["conv3_w"] = kg((nChannel, nFeat, 3, 3)); P["conv3_b"] = kg((nChannel,))
    return P


def fold3(w):   # 3x3 conv on 1x1 spatial -> center tap, transposed for x @ W
    return jnp.transpose(w[:, :, 1, 1])


def fold1(w):   # 1x1 conv -> transposed for x @ W
    return jnp.transpose(w[:, :, 0, 0])


def split_rows(wT, sizes):
    out, off = [], 0
    for s in sizes:
        out.append(wT[off:off + s, :])
        off += s
    return out


def pack_blocks(blocks, lane_w):
    """Stack weight blocks into one (total_rows, lane_w) slab; each block starts
    at an 8-aligned sublane offset.  Returns (slab, [(offset, K, N), ...])."""
    rows, specs, off = [], [], 0
    for blk in blocks:
        K, N = blk.shape
        padK = ((K + 7) // 8) * 8
        padded = jnp.zeros((padK, lane_w), jnp.float32).at[:K, :N].set(
            blk.astype(jnp.float32))
        rows.append(padded)
        specs.append((off, K, N))
        off += padK
    return jnp.concatenate(rows, axis=0), specs


def pack_biases(biases, lane_w):
    rows = []
    for b in biases:
        b = jnp.asarray(b, jnp.float32).reshape(-1)
        rows.append(jnp.zeros((lane_w,), jnp.float32).at[:b.shape[0]].set(b))
    return jnp.stack(rows, axis=0)


def build_kernel_params(P):
    r = scale
    lane_w = max(nFeat, growthRate, r * r * nChannel)

    wblocks = []
    # conv1 / conv2
    wblocks.append(fold3(P["conv1_w"]))                       # (nChannel, nFeat)
    wblocks.append(fold3(P["conv2_w"]))                       # (nFeat, nFeat)

    # RDBs: split dense / 1x1 weights along the input-channel axis
    for k in range(3):
        for l, w in enumerate(P[f"rdb{k}_dense"]):
            wT = fold3(w)                                     # (nFeat+l*g, g)
            wblocks += split_rows(wT, [nFeat] + [growthRate] * l)
        w1 = fold1(P[f"rdb{k}_1x1"])                          # (nFeat+nD*g, nFeat)
        wblocks += split_rows(w1, [nFeat] + [growthRate] * nDenselayer)

    # GFF_1x1 split over [F_1, F_2, F_3]; GFF_3x3 center tap
    wblocks += split_rows(fold1(P["gff1_w"]), [nFeat] * 3)
    wblocks.append(fold3(P["gff3_w"]))

    # conv_up(center tap) + PixelShuffle + conv3 folded into one matrix + bias.
    # PixelShuffle: conv_up out-channel c*r*r + i*r + j -> pixel (i, j), channel c.
    Wup = P["up_w"][:, :, 1, 1].reshape(nFeat, r, r, nFeat)   # (c_feat, i, j, c_in)
    Bup = P["up_b"].reshape(nFeat, r, r)
    m_cols, b_cols = [], []
    for i in range(r):
        for j in range(r):
            acc_w = jnp.zeros((nFeat, nChannel), jnp.float32)
            acc_b = P["conv3_b"].astype(jnp.float32)
            for a in range(3):
                for c in range(3):
                    ii, jj = i + a - 1, j + c - 1
                    if 0 <= ii < r and 0 <= jj < r:
                        Wij = jnp.transpose(Wup[:, ii, jj, :])          # (in, feat)
                        W3t = jnp.transpose(P["conv3_w"][:, :, a, c])   # (feat, nC)
                        acc_w = acc_w + Wij @ W3t
                        acc_b = acc_b + Bup[:, ii, jj] @ W3t
            m_cols.append(acc_w)
            b_cols.append(acc_b)
    wblocks.append(jnp.concatenate(m_cols, axis=1))           # (nFeat, r*r*nC)
    bM = jnp.concatenate(b_cols, axis=0)                      # (r*r*nC,)

    w_slab, wspecs = pack_blocks(wblocks, lane_w)
    biases = [P["conv1_b"], P["conv2_b"], P["gff1_b"], P["gff3_b"], bM]
    bias_widths = [int(np.asarray(b).reshape(-1).shape[0]) for b in biases]
    b_slab = pack_biases(biases, lane_w)
    return w_slab, b_slab, wspecs, bias_widths


# ----------------------------- wrapper ---------------------------------------
def rdn_forward(x, P):
    r = scale
    w_slab, b_slab, wspecs, bias_widths = build_kernel_params(P)
    kernel = make_rdn_kernel(wspecs, bias_widths)
    Bsz = x.shape[0]

    # Single invocation (no grid): whole batch + both parameter slabs fit trivially
    # in VMEM (~30 KB), so there is nothing to pipeline at this size.
    out_flat = pl.pallas_call(
        kernel,
        out_shape=jax.ShapeDtypeStruct((Bsz, r * r * nChannel), jnp.float32),
    )(x.astype(jnp.float32), w_slab, b_slab)

    # (B, r*r*nChannel) -> (B, nChannel, r, r)  (NCHW, matching PyTorch output)
    return jnp.transpose(out_flat.reshape(Bsz, r, r, nChannel), (0, 3, 1, 2))


# ----------------------- pure-JAX reference (for checking) -------------------
def conv2d_ref(x, w, b=None, pad=1):
    y = jax.lax.conv_general_dilated(
        x, w, (1, 1), ((pad, pad), (pad, pad)),
        dimension_numbers=("NCHW", "OIHW", "NCHW"))
    if b is not None:
        y = y + b.reshape(1, -1, 1, 1)
    return y


def pixel_shuffle_ref(x, r):
    b, c, h, w = x.shape
    x = x.reshape(b, c // (r * r), r, r, h, w)
    x = jnp.transpose(x, (0, 1, 4, 2, 5, 3))
    return x.reshape(b, c // (r * r), h * r, w * r)


def rdn_reference(x, P):
    x4 = x[:, :, None, None]                                  # (B, nChannel, 1, 1)
    F_ = conv2d_ref(x4, P["conv1_w"], P["conv1_b"], pad=1)
    F_0 = conv2d_ref(F_, P["conv2_w"], P["conv2_b"], pad=1)

    def rdb(h_in, k):
        h = h_in
        for w in P[f"rdb{k}_dense"]:
            o = jax.nn.relu(conv2d_ref(h, w, None, pad=1))
            h = jnp.concatenate([h, o], axis=1)
        return conv2d_ref(h, P[f"rdb{k}_1x1"], None, pad=0) + h_in

    F_1 = rdb(F_0, 0)
    F_2 = rdb(F_1, 1)
    F_3 = rdb(F_2, 2)
    FF = jnp.concatenate([F_1, F_2, F_3], axis=1)
    FdLF = conv2d_ref(FF, P["gff1_w"], P["gff1_b"], pad=0)
    FGF = conv2d_ref(FdLF, P["gff3_w"], P["gff3_b"], pad=1)
    FDF = FGF + F_
    us = conv2d_ref(FDF, P["up_w"], P["up_b"], pad=1)
    us = pixel_shuffle_ref(us, scale)
    return conv2d_ref(us, P["conv3_w"], P["conv3_b"], pad=1)


# ------------------------------- main ----------------------------------------
if __name__ == "__main__":
    key = jax.random.PRNGKey(0)
    kx, kp = jax.random.split(key)
    x = jax.random.normal(kx, (B, nChannel), jnp.float32)     # (batch, [t, x, y])
    P = init_params(kp)

    out = jax.block_until_ready(rdn_forward(x, P))
    ref = jax.block_until_ready(rdn_reference(x, P))

    assert out.shape == (B, nChannel, scale, scale), out.shape
    if not np.allclose(np.asarray(out), np.asarray(ref), rtol=1e-3, atol=1e-3):
        raise AssertionError(
            f"kernel/reference mismatch: max abs diff "
            f"{np.max(np.abs(np.asarray(out) - np.asarray(ref)))}")
    print("KERNEL_OK")
</pallas_src>

<mosaic_0001>
module attributes {stable_mosaic.version = 11 : i64} {
  func.func @kernel(%arg0: memref<16x3xf32, #tpu.memory_space<vmem>>, %arg1: memref<440x16xf32, #tpu.memory_space<vmem>>, %arg2: memref<5x16xf32, #tpu.memory_space<vmem>>, %arg3: memref<16x12xf32, #tpu.memory_space<vmem>>) attributes {dimension_semantics = [], scalar_prefetch = 0 : i64, scratch_operands = 0 : i64, tpu.core_type = #tpu.core_type<tc>} {
    %c0 = arith.constant 0 : index
    %c0_0 = arith.constant 0 : index
    %0 = vector.load %arg0[%c0, %c0_0] : memref<16x3xf32, #tpu.memory_space<vmem>>, vector<16x3xf32>
    %c0_1 = arith.constant 0 : index
    %c0_2 = arith.constant 0 : index
    %1 = vector.load %arg1[%c0_1, %c0_2] : memref<440x16xf32, #tpu.memory_space<vmem>>, vector<3x16xf32>
    %cst = arith.constant dense<0.000000e+00> : vector<16x16xf32>
    %2 = tpu.matmul %0, %1, %cst {dimension_numbers = #tpu.dot_dimension_numbers<[1], [0], [0], [1], [0, 0, 1, 1], [], []>} : vector<16x3xf32>, vector<3x16xf32>, vector<16x16xf32> -> vector<16x16xf32>
    %c0_3 = arith.constant 0 : index
    %c0_4 = arith.constant 0 : index
    %3 = vector.load %arg2[%c0_3, %c0_4] : memref<5x16xf32, #tpu.memory_space<vmem>>, vector<1x16xf32>
    %4 = vector.broadcast %3 : vector<1x16xf32> to vector<16x16xf32>
    %5 = arith.addf %2, %4 : vector<16x16xf32>
    %c8 = arith.constant 8 : index
    %c0_5 = arith.constant 0 : index
    %6 = vector.load %arg1[%c8, %c0_5] : memref<440x16xf32, #tpu.memory_space<vmem>>, vector<16x16xf32>
    %cst_6 = arith.constant dense<0.000000e+00> : vector<16x16xf32>
    %7 = tpu.matmul %5, %6, %cst_6 {dimension_numbers = #tpu.dot_dimension_numbers<[1], [0], [0], [1], [0, 0, 1, 1], [], []>} : vector<16x16xf32>, vector<16x16xf32>, vector<16x16xf32> -> vector<16x16xf32>
    %c1 = arith.constant 1 : index
    %c0_7 = arith.constant 0 : index
    %8 = vector.load %arg2[%c1, %c0_7] : memref<5x16xf32, #tpu.memory_space<vmem>>, vector<1x16xf32>
    %9 = vector.broadcast %8 : vector<1x16xf32> to vector<16x16xf32>
    %10 = arith.addf %7, %9 : vector<16x16xf32>
    %c24 = arith.constant 24 : index
    %c0_8 = arith.constant 0 : index
    %11 = vector.load %arg1[%c24, %c0_8] : memref<440x16xf32, #tpu.memory_space<vmem>>, vector<16x8xf32>
    %cst_9 = arith.constant dense<0.000000e+00> : vector<16x8xf32>
    %12 = tpu.matmul %10, %11, %cst_9 {dimension_numbers = #tpu.dot_dimension_numbers<[1], [0], [0], [1], [0, 0, 1, 1], [], []>} : vector<16x16xf32>, vector<16x8xf32>, vector<16x8xf32> -> vector<16x8xf32>
    %cst_10 = arith.constant 0.000000e+00 : f32
    %13 = vector.broadcast %cst_10 : f32 to vector<16x8xf32>
    %14 = arith.maximumf %12, %13 : vector<16x8xf32>
    %c40 = arith.constant 40 : index
    %c0_11 = arith.constant 0 : index
    %15 = vector.load %arg1[%c40, %c0_11] : memref<440x16xf32, #tpu.memory_space<vmem>>, vector<16x8xf32>
    %cst_12 = arith.constant dense<0.000000e+00> : vector<16x8xf32>
    %16 = tpu.matmul %10, %15, %cst_12 {dimension_numbers = #tpu.dot_dimension_numbers<[1], [0], [0], [1], [0, 0, 1, 1], [], []>} : vector<16x16xf32>, vector<16x8xf32>, vector<16x8xf32> -> vector<16x8xf32>
    %c56 = arith.constant 56 : index
    %c0_13 = arith.constant 0 : index
    %17 = vector.load %arg1[%c56, %c0_13] : memref<440x16xf32, #tpu.memory_space<vmem>>, vector<8x8xf32>
    %cst_14 = arith.constant dense<0.000000e+00> : vector<16x8xf32>
    %18 = tpu.matmul %14, %17, %cst_14 {dimension_numbers = #tpu.dot_dimension_numbers<[1], [0], [0], [1], [0, 0, 1, 1], [], []>} : vector<16x8xf32>, vector<8x8xf32>, vector<16x8xf32> -> vector<16x8xf32>
    %19 = arith.addf %16, %18 : vector<16x8xf32>
    %cst_15 = arith.constant 0.000000e+00 : f32
    %20 = vector.broadcast %cst_15 : f32 to vector<16x8xf32>
    %21 = arith.maximumf %19, %20 : vector<16x8xf32>
    %c64 = arith.constant 64 : index
    %c0_16 = arith.constant 0 : index
    %22 = vector.load %arg1[%c64, %c0_16] : memref<440x16xf32, #tpu.memory_space<vmem>>, vector<16x8xf32>
    %cst_17 = arith.constant dense<0.000000e+00> : vector<16x8xf32>
    %23 = tpu.matmul %10, %22, %cst_17 {dimension_numbers = #tpu.dot_dimension_numbers<[1], [0], [0], [1], [0, 0, 1, 1], [], []>} : vector<16x16xf32>, vector<16x8xf32>, vector<16x8xf32> -> vector<16x8xf32>
    %c80 = arith.constant 80 : index
    %c0_18 = arith.constant 0 : index
    %24 = vector.load %arg1[%c80, %c0_18] : memref<440x16xf32, #tpu.memory_space<vmem>>, vector<8x8xf32>
    %cst_19 = arith.constant dense<0.000000e+00> : vector<16x8xf32>
    %25 = tpu.matmul %14, %24, %cst_19 {dimension_numbers = #tpu.dot_dimension_numbers<[1], [0], [0], [1], [0, 0, 1, 1], [], []>} : vector<16x8xf32>, vector<8x8xf32>, vector<16x8xf32> -> vector<16x8xf32>
    %26 = arith.addf %23, %25 : vector<16x8xf32>
    %c88 = arith.constant 88 : index
    %c0_20 = arith.constant 0 : index
    %27 = vector.load %arg1[%c88, %c0_20] : memref<440x16xf32, #tpu.memory_space<vmem>>, vector<8x8xf32>
    %cst_21 = arith.constant dense<0.000000e+00> : vector<16x8xf32>
    %28 = tpu.matmul %21, %27, %cst_21 {dimension_numbers = #tpu.dot_dimension_numbers<[1], [0], [0], [1], [0, 0, 1, 1], [], []>} : vector<16x8xf32>, vector<8x8xf32>, vector<16x8xf32> -> vector<16x8xf32>
    %29 = arith.addf %26, %28 : vector<16x8xf32>
    %cst_22 = arith.constant 0.000000e+00 : f32
    %30 = vector.broadcast %cst_22 : f32 to vector<16x8xf32>
    %31 = arith.maximumf %29, %30 : vector<16x8xf32>
    %c96 = arith.constant 96 : index
    %c0_23 = arith.constant 0 : index
    %32 = vector.load %arg1[%c96, %c0_23] : memref<440x16xf32, #tpu.memory_space<vmem>>, vector<16x16xf32>
    %cst_24 = arith.constant dense<0.000000e+00> : vector<16x16xf32>
    %33 = tpu.matmul %10, %32, %cst_24 {dimension_numbers = #tpu.dot_dimension_numbers<[1], [0], [0], [1], [0, 0, 1, 1], [], []>} : vector<16x16xf32>, vector<16x16xf32>, vector<16x16xf32> -> vector<16x16xf32>
    %c112 = arith.constant 112 : index
    %c0_25 = arith.constant 0 : index
    %34 = vector.load %arg1[%c112, %c0_25] : memref<440x16xf32, #tpu.memory_space<vmem>>, vector<8x16xf32>
    %cst_26 = arith.constant dense<0.000000e+00> : vector<16x16xf32>
    %35 = tpu.matmul %14, %34, %cst_26 {dimension_numbers = #tpu.dot_dimension_numbers<[1], [0], [0], [1], [0, 0, 1, 1], [], []>} : vector<16x8xf32>, vector<8x16xf32>, vector<16x16xf32> -> vector<16x16xf32>
    %36 = arith.addf %33, %35 : vector<16x16xf32>
    %c120 = arith.constant 120 : index
    %c0_27 = arith.constant 0 : index
    %37 = vector.load %arg1[%c120, %c0_27] : memref<440x16xf32, #tpu.memory_space<vmem>>, vector<8x16xf32>
    %cst_28 = arith.constant dense<0.000000e+00> : vector<16x16xf32>
    %38 = tpu.matmul %21, %37, %cst_28 {dimension_numbers = #tpu.dot_dimension_numbers<[1], [0], [0], [1], [0, 0, 1, 1], [], []>} : vector<16x8xf32>, vector<8x16xf32>, vector<16x16xf32> -> vector<16x16xf32>
    %39 = arith.addf %36, %38 : vector<16x16xf32>
    %c128 = arith.constant 128 : index
    %c0_29 = arith.constant 0 : index
    %40 = vector.load %arg1[%c128, %c0_29] : memref<440x16xf32, #tpu.memory_space<vmem>>, vector<8x16xf32>
    %cst_30 = arith.constant dense<0.000000e+00> : vector<16x16xf32>
    %41 = tpu.matmul %31, %40, %cst_30 {dimension_numbers = #tpu.dot_dimension_numbers<[1], [0], [0], [1], [0, 0, 1, 1], [], []>} : vector<16x8xf32>, vector<8x16xf32>, vector<16x16xf32> -> vector<16x16xf32>
    %42 = arith.addf %39, %41 : vector<16x16xf32>
    %43 = arith.addf %42, %10 : vector<16x16xf32>
    %c136 = arith.constant 136 : index
    %c0_31 = arith.constant 0 : index
    %44 = vector.load %arg1[%c136, %c0_31] : memref<440x16xf32, #tpu.memory_space<vmem>>, vector<16x8xf32>
    %cst_32 = arith.constant dense<0.000000e+00> : vector<16x8xf32>
    %45 = tpu.matmul %43, %44, %cst_32 {dimension_numbers = #tpu.dot_dimension_numbers<[1], [0], [0], [1], [0, 0, 1, 1], [], []>} : vector<16x16xf32>, vector<16x8xf32>, vector<16x8xf32> -> vector<16x8xf32>
    %cst_33 = arith.constant 0.000000e+00 : f32
    %46 = vector.broadcast %cst_33 : f32 to vector<16x8xf32>
    %47 = arith.maximumf %45, %46 : vector<16x8xf32>
    %c152 = arith.constant 152 : index
    %c0_34 = arith.constant 0 : index
    %48 = vector.load %arg1[%c152, %c0_34] : memref<440x16xf32, #tpu.memory_space<vmem>>, vector<16x8xf32>
    %cst_35 = arith.constant dense<0.000000e+00> : vector<16x8xf32>
    %49 = tpu.matmul %43, %48, %cst_35 {dimension_numbers = #tpu.dot_dimension_numbers<[1], [0], [0], [1], [0, 0, 1, 1], [], []>} : vector<16x16xf32>, vector<16x8xf32>, vector<16x8xf32> -> vector<16x8xf32>
    %c168 = arith.constant 168 : index
    %c0_36 = arith.constant 0 : index
    %50 = vector.load %arg1[%c168, %c0_36] : memref<440x16xf32, #tpu.memory_space<vmem>>, vector<8x8xf32>
    %cst_37 = arith.constant dense<0.000000e+00> : vector<16x8xf32>
    %51 = tpu.matmul %47, %50, %cst_37 {dimension_numbers = #tpu.dot_dimension_numbers<[1], [0], [0], [1], [0, 0, 1, 1], [], []>} : vector<16x8xf32>, vector<8x8xf32>, vector<16x8xf32> -> vector<16x8xf32>
    %52 = arith.addf %49, %51 : vector<16x8xf32>
    %cst_38 = arith.constant 0.000000e+00 : f32
    %53 = vector.broadcast %cst_38 : f32 to vector<16x8xf32>
    %54 = arith.maximumf %52, %53 : vector<16x8xf32>
    %c176 = arith.constant 176 : index
    %c0_39 = arith.constant 0 : index
    %55 = vector.load %arg1[%c176, %c0_39] : memref<440x16xf32, #tpu.memory_space<vmem>>, vector<16x8xf32>
    %cst_40 = arith.constant dense<0.000000e+00> : vector<16x8xf32>
    %56 = tpu.matmul %43, %55, %cst_40 {dimension_numbers = #tpu.dot_dimension_numbers<[1], [0], [0], [1], [0, 0, 1, 1], [], []>} : vector<16x16xf32>, vector<16x8xf32>, vector<16x8xf32> -> vector<16x8xf32>
    %c192 = arith.constant 192 : index
    %c0_41 = arith.constant 0 : index
    %57 = vector.load %arg1[%c192, %c0_41] : memref<440x16xf32, #tpu.memory_space<vmem>>, vector<8x8xf32>
    %cst_42 = arith.constant dense<0.000000e+00> : vector<16x8xf32>
    %58 = tpu.matmul %47, %57, %cst_42 {dimension_numbers = #tpu.dot_dimension_numbers<[1], [0], [0], [1], [0, 0, 1, 1], [], []>} : vector<16x8xf32>, vector<8x8xf32>, vector<16x8xf32> -> vector<16x8xf32>
    %59 = arith.addf %56, %58 : vector<16x8xf32>
    %c200 = arith.constant 200 : index
    %c0_43 = arith.constant 0 : index
    %60 = vector.load %arg1[%c200, %c0_43] : memref<440x16xf32, #tpu.memory_space<vmem>>, vector<8x8xf32>
    %cst_44 = arith.constant dense<0.000000e+00> : vector<16x8xf32>
    %61 = tpu.matmul %54, %60, %cst_44 {dimension_numbers = #tpu.dot_dimension_numbers<[1], [0], [0], [1], [0, 0, 1, 1], [], []>} : vector<16x8xf32>, vector<8x8xf32>, vector<16x8xf32> -> vector<16x8xf32>
    %62 = arith.addf %59, %61 : vector<16x8xf32>
    %cst_45 = arith.constant 0.000000e+00 : f32
    %63 = vector.broadcast %cst_45 : f32 to vector<16x8xf32>
    %64 = arith.maximumf %62, %63 : vector<16x8xf32>
    %c208 = arith.constant 208 : index
    %c0_46 = arith.constant 0 : index
    %65 = vector.load %arg1[%c208, %c0_46] : memref<440x16xf32, #tpu.memory_space<vmem>>, vector<16x16xf32>
    %cst_47 = arith.constant dense<0.000000e+00> : vector<16x16xf32>
    %66 = tpu.matmul %43, %65, %cst_47 {dimension_numbers = #tpu.dot_dimension_numbers<[1], [0], [0], [1], [0, 0, 1, 1], [], []>} : vector<16x16xf32>, vector<16x16xf32>, vector<16x16xf32> -> vector<16x16xf32>
    %c224 = arith.constant 224 : index
    %c0_48 = arith.constant 0 : index
    %67 = vector.load %arg1[%c224, %c0_48] : memref<440x16xf32, #tpu.memory_space<vmem>>, vector<8x16xf32>
    %cst_49 = arith.constant dense<0.000000e+00> : vector<16x16xf32>
    %68 = tpu.matmul %47, %67, %cst_49 {dimension_numbers = #tpu.dot_dimension_numbers<[1], [0], [0], [1], [0, 0, 1, 1], [], []>} : vector<16x8xf32>, vector<8x16xf32>, vector<16x16xf32> -> vector<16x16xf32>
    %69 = arith.addf %66, %68 : vector<16x16xf32>
    %c232 = arith.constant 232 : index
    %c0_50 = arith.constant 0 : index
    %70 = vector.load %arg1[%c232, %c0_50] : memref<440x16xf32, #tpu.memory_space<vmem>>, vector<8x16xf32>
    %cst_51 = arith.constant dense<0.000000e+00> : vector<16x16xf32>
    %71 = tpu.matmul %54, %70, %cst_51 {dimension_numbers = #tpu.dot_dimension_numbers<[1], [0], [0], [1], [0, 0, 1, 1], [], []>} : vector<16x8xf32>, vector<8x16xf32>, vector<16x16xf32> -> vector<16x16xf32>
    %72 = arith.addf %69, %71 : vector<16x16xf32>
    %c240 = arith.constant 240 : index
    %c0_52 = arith.constant 0 : index
    %73 = vector.load %arg1[%c240, %c0_52] : memref<440x16xf32, #tpu.memory_space<vmem>>, vector<8x16xf32>
    %cst_53 = arith.constant dense<0.000000e+00> : vector<16x16xf32>
    %74 = tpu.matmul %64, %73, %cst_53 {dimension_numbers = #tpu.dot_dimension_numbers<[1], [0], [0], [1], [0, 0, 1, 1], [], []>} : vector<16x8xf32>, vector<8x16xf32>, vector<16x16xf32> -> vector<16x16xf32>
    %75 = arith.addf %72, %74 : vector<16x16xf32>
    %76 = arith.addf %75, %43 : vector<16x16xf32>
    %c248 = arith.constant 248 : index
    %c0_54 = arith.constant 0 : index
    %77 = vector.load %arg1[%c248, %c0_54] : memref<440x16xf32, #tpu.memory_space<vmem>>, vector<16x8xf32>
    %cst_55 = arith.constant dense<0.000000e+00> : vector<16x8xf32>
    %78 = tpu.matmul %76, %77, %cst_55 {dimension_numbers = #tpu.dot_dimension_numbers<[1], [0], [0], [1], [0, 0, 1, 1], [], []>} : vector<16x16xf32>, vector<16x8xf32>, vector<16x8xf32> -> vector<16x8xf32>
    %cst_56 = arith.constant 0.000000e+00 : f32
    %79 = vector.broadcast %cst_56 : f32 to vector<16x8xf32>
    %80 = arith.maximumf %78, %79 : vector<16x8xf32>
    %c264 = arith.constant 264 : index
    %c0_57 = arith.constant 0 : index
    %81 = vector.load %arg1[%c264, %c0_57] : memref<440x16xf32, #tpu.memory_space<vmem>>, vector<16x8xf32>
    %cst_58 = arith.constant dense<0.000000e+00> : vector<16x8xf32>
    %82 = tpu.matmul %76, %81, %cst_58 {dimension_numbers = #tpu.dot_dimension_numbers<[1], [0], [0], [1], [0, 0, 1, 1], [], []>} : vector<16x16xf32>, vector<16x8xf32>, vector<16x8xf32> -> vector<16x8xf32>
    %c280 = arith.constant 280 : index
    %c0_59 = arith.constant 0 : index
    %83 = vector.load %arg1[%c280, %c0_59] : memref<440x16xf32, #tpu.memory_space<vmem>>, vector<8x8xf32>
    %cst_60 = arith.constant dense<0.000000e+00> : vector<16x8xf32>
    %84 = tpu.matmul %80, %83, %cst_60 {dimension_numbers = #tpu.dot_dimension_numbers<[1], [0], [0], [1], [0, 0, 1, 1], [], []>} : vector<16x8xf32>, vector<8x8xf32>, vector<16x8xf32> -> vector<16x8xf32>
    %85 = arith.addf %82, %84 : vector<16x8xf32>
    %cst_61 = arith.constant 0.000000e+00 : f32
    %86 = vector.broadcast %cst_61 : f32 to vector<16x8xf32>
    %87 = arith.maximumf %85, %86 : vector<16x8xf32>
    %c288 = arith.constant 288 : index
    %c0_62 = arith.constant 0 : index
    %88 = vector.load %arg1[%c288, %c0_62] : memref<440x16xf32, #tpu.memory_space<vmem>>, vector<16x8xf32>
    %cst_63 = arith.constant dense<0.000000e+00> : vector<16x8xf32>
    %89 = tpu.matmul %76, %88, %cst_63 {dimension_numbers = #tpu.dot_dimension_numbers<[1], [0], [0], [1], [0, 0, 1, 1], [], []>} : vector<16x16xf32>, vector<16x8xf32>, vector<16x8xf32> -> vector<16x8xf32>
    %c304 = arith.constant 304 : index
    %c0_64 = arith.constant 0 : index
    %90 = vector.load %arg1[%c304, %c0_64] : memref<440x16xf32, #tpu.memory_space<vmem>>, vector<8x8xf32>
    %cst_65 = arith.constant dense<0.000000e+00> : vector<16x8xf32>
    %91 = tpu.matmul %80, %90, %cst_65 {dimension_numbers = #tpu.dot_dimension_numbers<[1], [0], [0], [1], [0, 0, 1, 1], [], []>} : vector<16x8xf32>, vector<8x8xf32>, vector<16x8xf32> -> vector<16x8xf32>
    %92 = arith.addf %89, %91 : vector<16x8xf32>
    %c312 = arith.constant 312 : index
    %c0_66 = arith.constant 0 : index
    %93 = vector.load %arg1[%c312, %c0_66] : memref<440x16xf32, #tpu.memory_space<vmem>>, vector<8x8xf32>
    %cst_67 = arith.constant dense<0.000000e+00> : vector<16x8xf32>
    %94 = tpu.matmul %87, %93, %cst_67 {dimension_numbers = #tpu.dot_dimension_numbers<[1], [0], [0], [1], [0, 0, 1, 1], [], []>} : vector<16x8xf32>, vector<8x8xf32>, vector<16x8xf32> -> vector<16x8xf32>
    %95 = arith.addf %92, %94 : vector<16x8xf32>
    %cst_68 = arith.constant 0.000000e+00 : f32
    %96 = vector.broadcast %cst_68 : f32 to vector<16x8xf32>
    %97 = arith.maximumf %95, %96 : vector<16x8xf32>
    %c320 = arith.constant 320 : index
    %c0_69 = arith.constant 0 : index
    %98 = vector.load %arg1[%c320, %c0_69] : memref<440x16xf32, #tpu.memory_space<vmem>>, vector<16x16xf32>
    %cst_70 = arith.constant dense<0.000000e+00> : vector<16x16xf32>
    %99 = tpu.matmul %76, %98, %cst_70 {dimension_numbers = #tpu.dot_dimension_numbers<[1], [0], [0], [1], [0, 0, 1, 1], [], []>} : vector<16x16xf32>, vector<16x16xf32>, vector<16x16xf32> -> vector<16x16xf32>
    %c336 = arith.constant 336 : index
    %c0_71 = arith.constant 0 : index
    %100 = vector.load %arg1[%c336, %c0_71] : memref<440x16xf32, #tpu.memory_space<vmem>>, vector<8x16xf32>
    %cst_72 = arith.constant dense<0.000000e+00> : vector<16x16xf32>
    %101 = tpu.matmul %80, %100, %cst_72 {dimension_numbers = #tpu.dot_dimension_numbers<[1], [0], [0], [1], [0, 0, 1, 1], [], []>} : vector<16x8xf32>, vector<8x16xf32>, vector<16x16xf32> -> vector<16x16xf32>
    %102 = arith.addf %99, %101 : vector<16x16xf32>
    %c344 = arith.constant 344 : index
    %c0_73 = arith.constant 0 : index
    %103 = vector.load %arg1[%c344, %c0_73] : memref<440x16xf32, #tpu.memory_space<vmem>>, vector<8x16xf32>
    %cst_74 = arith.constant dense<0.000000e+00> : vector<16x16xf32>
    %104 = tpu.matmul %87, %103, %cst_74 {dimension_numbers = #tpu.dot_dimension_numbers<[1], [0], [0], [1], [0, 0, 1, 1], [], []>} : vector<16x8xf32>, vector<8x16xf32>, vector<16x16xf32> -> vector<16x16xf32>
    %105 = arith.addf %102, %104 : vector<16x16xf32>
    %c352 = arith.constant 352 : index
    %c0_75 = arith.constant 0 : index
    %106 = vector.load %arg1[%c352, %c0_75] : memref<440x16xf32, #tpu.memory_space<vmem>>, vector<8x16xf32>
    %cst_76 = arith.constant dense<0.000000e+00> : vector<16x16xf32>
    %107 = tpu.matmul %97, %106, %cst_76 {dimension_numbers = #tpu.dot_dimension_numbers<[1], [0], [0], [1], [0, 0, 1, 1], [], []>} : vector<16x8xf32>, vector<8x16xf32>, vector<16x16xf32> -> vector<16x16xf32>
    %108 = arith.addf %105, %107 : vector<16x16xf32>
    %109 = arith.addf %108, %76 : vector<16x16xf32>
    %c360 = arith.constant 360 : index
    %c0_77 = arith.constant 0 : index
    %110 = vector.load %arg1[%c360, %c0_77] : memref<440x16xf32, #tpu.memory_space<vmem>>, vector<16x16xf32>
    %cst_78 = arith.constant dense<0.000000e+00> : vector<16x16xf32>
    %111 = tpu.matmul %43, %110, %cst_78 {dimension_numbers = #tpu.dot_dimension_numbers<[1], [0], [0], [1], [0, 0, 1, 1], [], []>} : vector<16x16xf32>, vector<16x16xf32>, vector<16x16xf32> -> vector<16x16xf32>
    %c376 = arith.constant 376 : index
    %c0_79 = arith.constant 0 : index
    %112 = vector.load %arg1[%c376, %c0_79] : memref<440x16xf32, #tpu.memory_space<vmem>>, vector<16x16xf32>
    %cst_80 = arith.constant dense<0.000000e+00> : vector<16x16xf32>
    %113 = tpu.matmul %76, %112, %cst_80 {dimension_numbers = #tpu.dot_dimension_numbers<[1], [0], [0], [1], [0, 0, 1, 1], [], []>} : vector<16x16xf32>, vector<16x16xf32>, vector<16x16xf32> -> vector<16x16xf32>
    %114 = arith.addf %111, %113 : vector<16x16xf32>
    %c392 = arith.constant 392 : index
    %c0_81 = arith.constant 0 : index
    %115 = vector.load %arg1[%c392, %c0_81] : memref<440x16xf32, #tpu.memory_space<vmem>>, vector<16x16xf32>
    %cst_82 = arith.constant dense<0.000000e+00> : vector<16x16xf32>
    %116 = tpu.matmul %109, %115, %cst_82 {dimension_numbers = #tpu.dot_dimension_numbers<[1], [0], [0], [1], [0, 0, 1, 1], [], []>} : vector<16x16xf32>, vector<16x16xf32>, vector<16x16xf32> -> vector<16x16xf32>
    %117 = arith.addf %114, %116 : vector<16x16xf32>
    %c2 = arith.constant 2 : index
    %c0_83 = arith.constant 0 : index
    %118 = vector.load %arg2[%c2, %c0_83] : memref<5x16xf32, #tpu.memory_space<vmem>>, vector<1x16xf32>
    %119 = vector.broadcast %118 : vector<1x16xf32> to vector<16x16xf32>
    %120 = arith.addf %117, %119 : vector<16x16xf32>
    %c408 = arith.constant 408 : index
    %c0_84 = arith.constant 0 : index
    %121 = vector.load %arg1[%c408, %c0_84] : memref<440x16xf32, #tpu.memory_space<vmem>>, vector<16x16xf32>
    %cst_85 = arith.constant dense<0.000000e+00> : vector<16x16xf32>
    %122 = tpu.matmul %120, %121, %cst_85 {dimension_numbers = #tpu.dot_dimension_numbers<[1], [0], [0], [1], [0, 0, 1, 1], [], []>} : vector<16x16xf32>, vector<16x16xf32>, vector<16x16xf32> -> vector<16x16xf32>
    %c3 = arith.constant 3 : index
    %c0_86 = arith.constant 0 : index
    %123 = vector.load %arg2[%c3, %c0_86] : memref<5x16xf32, #tpu.memory_space<vmem>>, vector<1x16xf32>
    %124 = vector.broadcast %123 : vector<1x16xf32> to vector<16x16xf32>
    %125 = arith.addf %122, %124 : vector<16x16xf32>
    %126 = arith.addf %125, %5 : vector<16x16xf32>
    %c424 = arith.constant 424 : index
    %c0_87 = arith.constant 0 : index
    %127 = vector.load %arg1[%c424, %c0_87] : memref<440x16xf32, #tpu.memory_space<vmem>>, vector<16x12xf32>
    %cst_88 = arith.constant dense<0.000000e+00> : vector<16x12xf32>
    %128 = tpu.matmul %126, %127, %cst_88 {dimension_numbers = #tpu.dot_dimension_numbers<[1], [0], [0], [1], [0, 0, 1, 1], [], []>} : vector<16x16xf32>, vector<16x12xf32>, vector<16x12xf32> -> vector<16x12xf32>
    %c4 = arith.constant 4 : index
    %c0_89 = arith.constant 0 : index
    %129 = vector.load %arg2[%c4, %c0_89] : memref<5x16xf32, #tpu.memory_space<vmem>>, vector<1x12xf32>
    %130 = vector.broadcast %129 : vector<1x12xf32> to vector<16x12xf32>
    %131 = arith.addf %128, %130 : vector<16x12xf32>
    %c0_90 = arith.constant 0 : index
    %c0_91 = arith.constant 0 : index
    %132 = vector.load %arg3[%c0_90, %c0_91] : memref<16x12xf32, #tpu.memory_space<vmem>>, vector<16x12xf32>
    tpu.vector_store %arg3[%c0_90, %c0_91], %131 {strides = array<i32>} : memref<16x12xf32, #tpu.memory_space<vmem>>, vector<16x12xf32>,
    return
  }
}

</mosaic_0001>

<bundles_post_ra>
// kernel: tpu_custom_call.1
= control target key start
LH: loop header
LB: loop body
LE: loop exit
PB: predicated region body
PF: predicated region fallthrough
CT: control target
= control target key end

     0   :  { %vm30_vm0 = vcmask 1042432   ;;  %vm23_vm1 = vcmask 23552   ;;  %s3964_s0 = inlined_call_operand.vmem [shape: f32[16,3], index: 0, kind: input, shape index: {}]   ;;  %s3965_s1 = inlined_call_operand.vmem [shape: f32[440,16], index: 1, kind: input, shape index: {}]   ;;  %s3966_s2 = inlined_call_operand.vmem [shape: f32[5,16], index: 2, kind: input, shape index: {}]   ;;  %s3967_s3 = inlined_call_operand.hbm [shape: f32[16,12], index: 3, kind: output, shape index: {}]  }
   0x1   :  { %v17_v0 = vld [vmem:[%s3965_s1] sm:$0x7]  ;;  %v16_v2 = vld [vmem:[%s3964_s0 + $0x8] sm:$0xff] }
   0x2   :  { %v15_v1 = vld [vmem:[%s3964_s0] sm:$0xff]  ;;  %3257 = vmatprep.subr.msk.mxu0 %vm30_vm0, %v17_v0 }
   0x3   :  { %3259 = vmatprep.mubr.msk.f32.mxu0 %vm23_vm1, %v15_v1 }
   0x4   :  { %8 = vsyncpa [#allocation3], 0  ;;  %3258 = vmatpush3.msk.msra.mxu0 %vm30_vm0, %v17_v0  ;;  %v109_v3 = vld [vmem:[%s3965_s1 + $0x8] sm:$0xff]  ;;  %v110_v4 = vld [vmem:[%s3965_s1 + $0x10] sm:$0xff]  ;;  %vm116_vm2 = vcmask 130048   ;;  %vm286_vm3 = vcmask 64512  }
   0x5   :  { %3260 = vmatmul.mubr.msk.f32.vlgmr.msra.gmra.mrb[0].mxu0 %vm23_vm1, %v16_v2  ;;  %v3478_v5 = vpack.c.bf16 %v110_v4, %v109_v3  ;;  %v3048_v6 = vld [vmem:[%s3966_s2] ss:$0 sm:$0xff]  ;;  %v198_v11 = vld [vmem:[%s3965_s1 + $0x18] sm:$0xff]  ;;  %v3052_v14 = vld [vmem:[%s3966_s2 + $0x1] ss:$0 sm:$0xff]  ;;  %s3617_s23 = smov [#allocation2]  }
   0x6   :  { %v199_v12 = vld [vmem:[%s3965_s1 + $0x20] sm:$0xff]  ;;  %v285_v19 = vld [vmem:[%s3965_s1 + $0x38] sm:$0xff]  ;;  %v447_v20 = vld [vmem:[%s3965_s1 + $0x50] sm:$0xff]  ;;  %s3037_s0 = sshll.u32 %s3617_s23, 4  ;;  %vm3029_vm4 = vcmask 97280   ;;  %s3038_s0 = int_to_ptr.vmem [resolvable:$true] %s3037_s0 }
   0x7   :  { %3479 = vmatprep.subr.bf16.mxu1 %v3478_v5  ;;  %v3482_v13 = vpack.c.bf16 %v199_v12, %v198_v11  ;;  %v283_v21 = vld [vmem:[%s3965_s1 + $0x28] sm:$0xff]  ;;  %v284_v22 = vld [vmem:[%s3965_s1 + $0x30] sm:$0xff]  ;;  %v445_v24 = vld [vmem:[%s3965_s1 + $0x40] sm:$0xff]  ;;  %s3593_s24 = scalar_lea.vmem %s3038_s0, 256  ;;  %p3598_p1 = scmp.lt.s32.totalorder %s3038_s0, %s3038_s0 }
   0x8   :  { %3481 = vmatpush3.bf16.msra.mxu1 %v3478_v5  ;;  %v3486_v23 = vpack.c.bf16 %v284_v22, %v283_v21  ;;  %v446_v25 = vld [vmem:[%s3965_s1 + $0x48] sm:$0xff]  ;;  %v686_v31 = vld [vmem:[%s3965_s1 + $0x70] sm:$0xff]  ;;  %v598_v32 = vld [vmem:[%s3965_s1 + $0x58] sm:$0xff]  ;;  %p3594_p0 = scmp.ne.s32.totalorder %s3038_s0, %s3593_s24  ;;  %p3599_p2 = scmp.lt.s32.totalorder %s3593_s24, %s3593_s24 }
   0x9   :  { %3483 = vmatprep.subr.bf16.mxu0 %v3482_v13  ;;  %3276 = vmatprep.subr.mxu1 %v285_v19  ;;  %v3490_v26 = vpack.c.bf16 %v446_v25, %v445_v24  ;;  %v684_v33 = vld [vmem:[%s3965_s1 + $0x60] sm:$0xff]  ;;  %v685_v34 = vld [vmem:[%s3965_s1 + $0x68] sm:$0xff]  ;;  %v837_v36 = vld [vmem:[%s3965_s1 + $0x78] sm:$0xff] }
   0xa   :  { %3485 = vmatpush3.bf16.msra.mxu0 %v3482_v13  ;;  %v3494_v35 = vpack.c.bf16 %v685_v34, %v684_v33  ;;  %v915_v37 = vld [vmem:[%s3965_s1 + $0x80] sm:$0xff]  ;;  %v1001_v46 = vld [vmem:[%s3965_s1 + $0x88] sm:$0xff]  ;;  %v1002_v47 = vld [vmem:[%s3965_s1 + $0x90] sm:$0xff]  ;;  %p3600_p3 = por %p3599_p2, %p3598_p1 }
   0xb   :  { %3288 = vmatprep.subr.mxu0 %v447_v20  ;;  %v3498_v48 = vpack.c.bf16 %v1002_v47, %v1001_v46  ;;  %v1088_v53 = vld [vmem:[%s3965_s1 + $0xa8] sm:$0xff]  ;;  %v1249_v54 = vld [vmem:[%s3965_s1 + $0xc0] sm:$0xff]  ;;  %v1086_v55 = vld [vmem:[%s3965_s1 + $0x98] sm:$0xff] }
   0xc   :  { %v1087_v56 = vld [vmem:[%s3965_s1 + $0xa0] sm:$0xff]  ;;  %v1247_v58 = vld [vmem:[%s3965_s1 + $0xb0] sm:$0xff]  ;;  %v1248_v59 = vld [vmem:[%s3965_s1 + $0xb8] sm:$0xff]  ;;  %p3601_p4 = pnand %p3600_p3, %p3594_p0 }
   0xd   :  { %v3502_v57 = vpack.c.bf16 %v1087_v56, %v1086_v55  ;;  %v3506_v60 = vpack.c.bf16 %v1248_v59, %v1247_v58  ;;  %v1488_v1 = vld [vmem:[%s3965_s1 + $0xe0] sm:$0xff]  ;;  %v1400_v2 = vld [vmem:[%s3965_s1 + $0xc8] sm:$0xff]  ;;  %v1486_v3 = vld [vmem:[%s3965_s1 + $0xd0] sm:$0xff] }
   0xe   :  { %v1487_v4 = vld [vmem:[%s3965_s1 + $0xd8] sm:$0xff]  ;;  %v2519_v46 = vld [vmem:[%s3965_s1 + $0x160] sm:$0xff]  ;;  %v2759_v56 = vld [vmem:[%s3965_s1 + $0x188] sm:$0xff] }
   0xf   :  { %v3510_v5 = vpack.c.bf16 %v1487_v4, %v1486_v3  ;;  %v1890_v25 = vld [vmem:[%s3965_s1 + $0x118] sm:$0xff]  ;;  %v3121_v4 = vld [vmem:[%s3966_s2 + $0x2] ss:$0 sm:$0xff] }
  0xd8   :  { %v3261_v7 = vpop.f32.mrb[0].mxu0 }
  0xd9   :  { %v100_v8 = vpop.f32.mrb[1].mxu0  ;;  %v3660_v10 = vadd.f32 %v3261_v7, %v3048_v6  ;;  %v1717_v7 = vld [vmem:[%s3965_s1 + $0xf0] sm:$0xff] }
  0xda   :  { %v3658_v9 = vadd.f32 %v3048_v6, %v100_v8  ;;  %v1639_v6 = vld [vmem:[%s3965_s1 + $0xe8] sm:$0xff] }
  0xdc   :  { %3266 = vmatprep.mubr.msk.f32.mxu1 %vm116_vm2, %v3658_v9 }
  0xdd   :  { %3267 = vmatmul.mubr.msk.f32.vlgmr.msra.gmra.mrb[0].mxu1 %vm116_vm2, %v3660_v10 }
  0xde   :  { %3277 = vmatpush3.msra.mxu1 %v285_v19  ;;  %v1804_v19 = vld [vmem:[%s3965_s1 + $0x100] sm:$0xff] }
  0xdf   :  { %3487 = vmatprep.subr.bf16.mxu1 %v3486_v23 }
 0x1b0   :  { %v3268_v15 = vpop.f32.mrb[0].mxu1 }
 0x1b1   :  { %v189_v16 = vpop.f32.mrb[1].mxu1  ;;  %v3677_v18 = vadd.f32 %v3268_v15, %v3052_v14 }
 0x1b2   :  { %v3675_v17 = vadd.f32 %v3052_v14, %v189_v16 }
 0x1b4   :  { %3273 = vmatprep.mubr.msk.f32.mxu0 %vm116_vm2, %v3675_v17 }
 0x1b5   :  { %3274 = vmatmul.mubr.msk.f32.vlgmr.msra.gmra.mrb[2].mxu0 %vm116_vm2, %v3677_v18 }
 0x1b6   :  { %3289 = vmatpush3.msra.mxu0 %v447_v20 }
 0x1b7   :  { %3491 = vmatprep.subr.bf16.mxu0 %v3490_v26 }
 0x288   :  { %v3275_v27 = vpop.f32.mrb[2].mxu0 }
 0x289   :  { %v272_v28 = vpop.f32.mrb[3].mxu0  ;;  %v282_v30 = vmax.f32 %v3275_v27, 0.0  ;;  %v1888_v27 = vld [vmem:[%s3965_s1 + $0x108] sm:$0xff] }
 0x28a   :  { %v281_v29 = vmax.f32 %v272_v28, 0.0  ;;  %v1889_v28 = vld [vmem:[%s3965_s1 + $0x110] sm:$0xff] }
 0x28c   :  { %3278 = vmatprep.mubr.msk.f32.mxu1 %vm286_vm3, %v281_v29  ;;  %3290 = vmatprep.mubr.msk.f32.mxu0 %vm286_vm3, %v281_v29 }
 0x28d   :  { %3279 = vmatmul.mubr.msk.f32.vlgmr.msra.gmra.mrb[2].mxu1 %vm286_vm3, %v282_v30  ;;  %3291 = vmatmul.mubr.msk.f32.vlgmr.msra.gmra.mrb[4].mxu0 %vm286_vm3, %v282_v30 }
 0x28e   :  { %3489 = vmatpush3.bf16.msra.mxu1 %v3486_v23  ;;  %3285 = vmatprep.mubr.msk.f32.mxu1 %vm116_vm2, %v3675_v17 }
 0x28f   :  { %3297 = vmatprep.mubr.msk.f32.mxu0 %vm116_vm2, %v3675_v17  ;;  %3493 = vmatpush3.bf16.msra.mxu0 %v3490_v26  ;;  %v2051_v26 = vld [vmem:[%s3965_s1 + $0x130] sm:$0xff] }
 0x290   :  { %3305 = vmatprep.subr.mxu1 %v686_v31  ;;  %3300 = vmatprep.subr.mxu0 %v598_v32 }
 0x295   :  { %3286 = vmatmul.mubr.msk.f32.vlgmr.msra.gmra.mrb[2].mxu1 %vm116_vm2, %v3677_v18  ;;  %3298 = vmatmul.mubr.msk.f32.vlgmr.msra.gmra.mrb[4].mxu0 %vm116_vm2, %v3677_v18 }
 0x296   :  { %3307 = vmatprep.mubr.msk.f32.mxu1 %vm286_vm3, %v281_v29  ;;  %3306 = vmatpush3.msra.mxu1 %v686_v31  ;;  %v3518_v29 = vpack.c.bf16 %v1889_v28, %v1888_v27  ;;  %v2050_v31 = vld [vmem:[%s3965_s1 + $0x128] sm:$0xff] }
 0x297   :  { %3495 = vmatprep.subr.bf16.mxu1 %v3494_v35  ;;  %3301 = vmatpush3.msra.mxu0 %v598_v32 }
 0x298   :  { %3499 = vmatprep.subr.bf16.mxu0 %v3498_v48 }
 0x299   :  { %3308 = vmatmul.mubr.msk.f32.vlgmr.msra.gmra.mrb[4].mxu1 %vm286_vm3, %v282_v30  ;;  %v2049_v30 = vld [vmem:[%s3965_s1 + $0x120] sm:$0xff] }
 0x29a   :  { %3314 = vmatprep.mubr.msk.f32.mxu1 %vm116_vm2, %v3675_v17  ;;  %3497 = vmatpush3.bf16.msra.mxu1 %v3494_v35  ;;  %v3522_v32 = vpack.c.bf16 %v2050_v31, %v2049_v30 }
 0x29b   :  { %3317 = vmatprep.subr.mxu1 %v837_v36 }
 0x2a1   :  { %3315 = vmatmul.mubr.msk.f32.vlgmr.msra.gmra.mrb[4].mxu1 %vm116_vm2, %v3677_v18 }
 0x2a2   :  { %3318 = vmatpush3.msra.mxu1 %v837_v36 }
 0x2a3   :  { %3322 = vmatprep.subr.mxu1 %v915_v37 }
 0x368   :  { %v3287_v38 = vpop.f32.mrb[2].mxu1 }
 0x369   :  { %v434_v39 = vpop.f32.mrb[3].mxu1  ;;  %v444_v41 = vmax.f32 %v3287_v38, 0.0  ;;  %v2202_v38 = vld [vmem:[%s3965_s1 + $0x138] sm:$0xff] }
 0x36a   :  { %v443_v40 = vmax.f32 %v434_v39, 0.0  ;;  %v2288_v39 = vld [vmem:[%s3965_s1 + $0x140] sm:$0xff] }
 0x36c   :  { %3302 = vmatprep.mubr.msk.f32.mxu0 %vm286_vm3, %v443_v40  ;;  %3319 = vmatprep.mubr.msk.f32.mxu1 %vm286_vm3, %v443_v40  ;;  %v2289_v40 = vld [vmem:[%s3965_s1 + $0x148] sm:$0xff] }
 0x36d   :  { %3303 = vmatmul.mubr.msk.f32.vlgmr.msra.gmra.mrb[4].mxu0 %vm286_vm3, %v444_v41  ;;  %3320 = vmatmul.mubr.msk.f32.vlgmr.msra.gmra.mrb[4].mxu1 %vm286_vm3, %v444_v41  ;;  %v3526_v41 = vpack.c.bf16 %v2289_v40, %v2288_v39 }
 0x36e   :  { %3323 = vmatpush3.msra.mxu1 %v915_v37  ;;  %3501 = vmatpush3.bf16.msra.mxu0 %v3498_v48  ;;  %v2290_v37 = vld [vmem:[%s3965_s1 + $0x150] sm:$0xff]  ;;  %v2605_v48 = vld [vmem:[%s3965_s1 + $0x168] sm:$0xff] }
 0x36f   :  { %3334 = vmatprep.subr.mxu0 %v1088_v53  ;;  %3346 = vmatprep.subr.mxu1 %v1249_v54 }
 0x440   :  { %v3304_v42 = vpop.f32.mrb[4].mxu0 }
 0x441   :  { %v671_v43 = vpop.f32.mrb[5].mxu0  ;;  %v683_v45 = vmax.f32 %v3304_v42, 0.0  ;;  %v2441_v42 = vld [vmem:[%s3965_s1 + $0x158] sm:$0xff] }
 0x442   :  { %v682_v44 = vmax.f32 %v671_v43, 0.0  ;;  %v2607_v43 = vld [vmem:[%s3965_s1 + $0x178] sm:$0xff] }
 0x444   :  { %3324 = vmatprep.mubr.msk.f32.mxu1 %vm286_vm3, %v682_v44  ;;  %v2608_v44 = vld [vmem:[%s3965_s1 + $0x180] sm:$0xff] }
 0x445   :  { %3325 = vmatmul.mubr.msk.f32.vlgmr.msra.gmra.mrb[4].mxu1 %vm286_vm3, %v683_v45  ;;  %v3530_v45 = vpack.c.bf16 %v2608_v44, %v2607_v43 }
 0x446   :  { %3347 = vmatpush3.msra.mxu1 %v1249_v54 }
 0x447   :  { %3507 = vmatprep.subr.bf16.mxu1 %v3506_v60 }
 0x518   :  { %v3326_v49 = vpop.f32.mrb[4].mxu1 }
 0x519   :  { %v988_v50 = vpop.f32.mrb[5].mxu1  ;;  %v3753_v52 = vadd.f32 %v3326_v49, %v3677_v18  ;;  %v1803_v18 = vld [vmem:[%s3965_s1 + $0xf8] sm:$0xff]  ;;  %v2606_v49 = vld [vmem:[%s3965_s1 + $0x170] sm:$0xff] }
 0x51a   :  { %v3750_v51 = vadd.f32 %v988_v50, %v3675_v17  ;;  %v3514_v20 = vpack.c.bf16 %v1804_v19, %v1803_v18  ;;  %v3534_v55 = vpack.c.bf16 %v2606_v49, %v2605_v48 }
 0x51c   :  { %3331 = vmatprep.mubr.msk.f32.mxu0 %vm116_vm2, %v3750_v51 }
 0x51d   :  { %3332 = vmatmul.mubr.msk.f32.vlgmr.msra.gmra.mrb[6].mxu0 %vm116_vm2, %v3753_v52 }
 0x51e   :  { %3335 = vmatpush3.msra.mxu0 %v1088_v53 }
 0x51f   :  { %3503 = vmatprep.subr.bf16.mxu0 %v3502_v57 }
 0x5f0   :  { %v3333_v61 = vpop.f32.mrb[6].mxu0 }
 0x5f1   :  { %v1075_v62 = vpop.f32.mrb[7].mxu0  ;;  %v1085_v0 = vmax.f32 %v3333_v61, 0.0 }
 0x5f2   :  { %v1084_v63 = vmax.f32 %v1075_v62, 0.0 }
 0x5f4   :  { %3336 = vmatprep.mubr.msk.f32.mxu0 %vm286_vm3, %v1084_v63  ;;  %3348 = vmatprep.mubr.msk.f32.mxu1 %vm286_vm3, %v1084_v63 }
 0x5f5   :  { %3337 = vmatmul.mubr.msk.f32.vlgmr.msra.gmra.mrb[8].mxu0 %vm286_vm3, %v1085_v0  ;;  %3349 = vmatmul.mubr.msk.f32.vlgmr.msra.gmra.mrb[6].mxu1 %vm286_vm3, %v1085_v0 }
 0x5f6   :  { %3505 = vmatpush3.bf16.msra.mxu0 %v3502_v57  ;;  %3343 = vmatprep.mubr.msk.f32.mxu0 %vm116_vm2, %v3750_v51  ;;  %v2760_v57 = vld [vmem:[%s3965_s1 + $0x190] sm:$0xff] }
 0x5f7   :  { %3355 = vmatprep.mubr.msk.f32.mxu1 %vm116_vm2, %v3750_v51  ;;  %3509 = vmatpush3.bf16.msra.mxu1 %v3506_v60  ;;  %v3538_v58 = vpack.c.bf16 %v2760_v57, %v2759_v56 }
 0x5f8   :  { %3363 = vmatprep.subr.mxu0 %v1488_v1  ;;  %3358 = vmatprep.subr.mxu1 %v1400_v2 }
 0x5fd   :  { %3344 = vmatmul.mubr.msk.f32.vlgmr.msra.gmra.mrb[8].mxu0 %vm116_vm2, %v3753_v52  ;;  %3356 = vmatmul.mubr.msk.f32.vlgmr.msra.gmra.mrb[6].mxu1 %vm116_vm2, %v3753_v52 }
 0x5fe   :  { %3365 = vmatprep.mubr.msk.f32.mxu0 %vm286_vm3, %v1084_v63  ;;  %3364 = vmatpush3.msra.mxu0 %v1488_v1  ;;  %v2851_v1 = vld [vmem:[%s3965_s1 + $0x198] sm:$0xff] }
 0x5ff   :  { %3511 = vmatprep.subr.bf16.mxu0 %v3510_v5  ;;  %3359 = vmatpush3.msra.mxu1 %v1400_v2  ;;  %v2852_v2 = vld [vmem:[%s3965_s1 + $0x1a0] sm:$0xff] }
 0x600   :  { %3515 = vmatprep.subr.bf16.mxu1 %v3514_v20  ;;  %v3542_v3 = vpack.c.bf16 %v2852_v2, %v2851_v1 }
 0x601   :  { %3366 = vmatmul.mubr.msk.f32.vlgmr.msra.gmra.mrb[10].mxu0 %vm286_vm3, %v1085_v0 }
 0x602   :  { %3372 = vmatprep.mubr.msk.f32.mxu0 %vm116_vm2, %v3750_v51  ;;  %3513 = vmatpush3.bf16.msra.mxu0 %v3510_v5 }
 0x603   :  { %3375 = vmatprep.subr.mxu0 %v1639_v6 }
 0x609   :  { %3373 = vmatmul.mubr.msk.f32.vlgmr.msra.gmra.mrb[10].mxu0 %vm116_vm2, %v3753_v52 }
 0x60a   :  { %3376 = vmatpush3.msra.mxu0 %v1639_v6 }
 0x60b   :  { %3380 = vmatprep.subr.mxu0 %v1717_v7 }
 0x6d0   :  { %v3345_v8 = vpop.f32.mrb[8].mxu0 }
 0x6d1   :  { %v1236_v11 = vpop.f32.mrb[9].mxu0  ;;  %v1246_v13 = vmax.f32 %v3345_v8, 0.0 }
 0x6d2   :  { %v1245_v12 = vmax.f32 %v1236_v11, 0.0  ;;  %v2941_v11 = vld [vmem:[%s3965_s1 + $0x1a8] sm:$0xff] }
 0x6d4   :  { %3360 = vmatprep.mubr.msk.f32.mxu1 %vm286_vm3, %v1245_v12  ;;  %3377 = vmatprep.mubr.msk.f32.mxu0 %vm286_vm3, %v1245_v12  ;;  %v2942_v12 = vld [vmem:[%s3965_s1 + $0x1b0] sm:$0xff] }
 0x6d5   :  { %3361 = vmatmul.mubr.msk.f32.vlgmr.msra.gmra.mrb[6].mxu1 %vm286_vm3, %v1246_v13  ;;  %3378 = vmatmul.mubr.msk.f32.vlgmr.msra.gmra.mrb[10].mxu0 %vm286_vm3, %v1246_v13  ;;  %v3546_v13 = vpack.c.bf16 %v2942_v12, %v2941_v11 }
 0x6d6   :  { %3381 = vmatpush3.msra.mxu0 %v1717_v7  ;;  %3517 = vmatpush3.bf16.msra.mxu1 %v3514_v20 }
 0x6d7   :  { %3392 = vmatprep.subr.mxu1 %v1890_v25  ;;  %3404 = vmatprep.subr.mxu0 %v2051_v26 }
 0x7a8   :  { %v3362_v14 = vpop.f32.mrb[6].mxu1 }
 0x7a9   :  { %v1473_v15 = vpop.f32.mrb[7].mxu1  ;;  %v1485_v17 = vmax.f32 %v3362_v14, 0.0  ;;  %v3122_v14 = vld [vmem:[%s3966_s2 + $0x3] ss:$0 sm:$0xff] }
 0x7aa   :  { %v1484_v16 = vmax.f32 %v1473_v15, 0.0 }
 0x7ac   :  { %3382 = vmatprep.mubr.msk.f32.mxu0 %vm286_vm3, %v1484_v16 }
 0x7ad   :  { %3383 = vmatmul.mubr.msk.f32.vlgmr.msra.gmra.mrb[10].mxu0 %vm286_vm3, %v1485_v17 }
 0x7ae   :  { %3405 = vmatpush3.msra.mxu0 %v2051_v26 }
 0x7af   :  { %3523 = vmatprep.subr.bf16.mxu0 %v3522_v32 }
 0x880   :  { %v3384_v21 = vpop.f32.mrb[10].mxu0 }
 0x881   :  { %v1790_v22 = vpop.f32.mrb[11].mxu0  ;;  %v3829_v24 = vadd.f32 %v3384_v21, %v3753_v52  ;;  %v3125_v21 = vld [vmem:[%s3966_s2 + $0x4] ss:$0 sm:$0xff] }
 0x882   :  { %v3826_v23 = vadd.f32 %v1790_v22, %v3750_v51 }
 0x884   :  { %3389 = vmatprep.mubr.msk.f32.mxu1 %vm116_vm2, %v3826_v23 }
 0x885   :  { %3390 = vmatmul.mubr.msk.f32.vlgmr.msra.gmra.mrb[8].mxu1 %vm116_vm2, %v3829_v24 }
 0x886   :  { %3393 = vmatpush3.msra.mxu1 %v1890_v25 }
 0x887   :  { %3519 = vmatprep.subr.bf16.mxu1 %v3518_v29 }
 0x958   :  { %v3391_v33 = vpop.f32.mrb[8].mxu1 }
 0x959   :  { %v1877_v34 = vpop.f32.mrb[9].mxu1  ;;  %v1887_v36 = vmax.f32 %v3391_v33, 0.0 }
 0x95a   :  { %v1886_v35 = vmax.f32 %v1877_v34, 0.0 }
 0x95c   :  { %3394 = vmatprep.mubr.msk.f32.mxu1 %vm286_vm3, %v1886_v35  ;;  %3406 = vmatprep.mubr.msk.f32.mxu0 %vm286_vm3, %v1886_v35 }
 0x95d   :  { %3395 = vmatmul.mubr.msk.f32.vlgmr.msra.gmra.mrb[10].mxu1 %vm286_vm3, %v1887_v36  ;;  %3407 = vmatmul.mubr.msk.f32.vlgmr.msra.gmra.mrb[12].mxu0 %vm286_vm3, %v1887_v36 }
 0x95e   :  { %3521 = vmatpush3.bf16.msra.mxu1 %v3518_v29  ;;  %3401 = vmatprep.mubr.msk.f32.mxu1 %vm116_vm2, %v3826_v23 }
 0x95f   :  { %3413 = vmatprep.mubr.msk.f32.mxu0 %vm116_vm2, %v3826_v23  ;;  %3525 = vmatpush3.bf16.msra.mxu0 %v3522_v32 }
 0x960   :  { %3421 = vmatprep.subr.mxu1 %v2290_v37  ;;  %3416 = vmatprep.subr.mxu0 %v2202_v38 }
 0x965   :  { %3402 = vmatmul.mubr.msk.f32.vlgmr.msra.gmra.mrb[10].mxu1 %vm116_vm2, %v3829_v24  ;;  %3414 = vmatmul.mubr.msk.f32.vlgmr.msra.gmra.mrb[12].mxu0 %vm116_vm2, %v3829_v24 }
 0x966   :  { %3423 = vmatprep.mubr.msk.f32.mxu1 %vm286_vm3, %v1886_v35  ;;  %3422 = vmatpush3.msra.mxu1 %v2290_v37 }
 0x967   :  { %3527 = vmatprep.subr.bf16.mxu1 %v3526_v41  ;;  %3417 = vmatpush3.msra.mxu0 %v2202_v38 }
 0x968   :  { %3531 = vmatprep.subr.bf16.mxu0 %v3530_v45 }
 0x969   :  { %3424 = vmatmul.mubr.msk.f32.vlgmr.msra.gmra.mrb[12].mxu1 %vm286_vm3, %v1887_v36 }
 0x96a   :  { %3430 = vmatprep.mubr.msk.f32.mxu1 %vm116_vm2, %v3826_v23  ;;  %3529 = vmatpush3.bf16.msra.mxu1 %v3526_v41 }
 0x96b   :  { %3433 = vmatprep.subr.mxu1 %v2441_v42 }
 0x971   :  { %3431 = vmatmul.mubr.msk.f32.vlgmr.msra.gmra.mrb[12].mxu1 %vm116_vm2, %v3829_v24 }
 0x972   :  { %3434 = vmatpush3.msra.mxu1 %v2441_v42 }
 0x973   :  { %3438 = vmatprep.subr.mxu1 %v2519_v46 }
 0xa38   :  { %v3403_v47 = vpop.f32.mrb[10].mxu1 }
 0xa39   :  { %v2038_v50 = vpop.f32.mrb[11].mxu1  ;;  %v2048_v54 = vmax.f32 %v3403_v47, 0.0 }
 0xa3a   :  { %v2047_v53 = vmax.f32 %v2038_v50, 0.0 }
 0xa3c   :  { %3418 = vmatprep.mubr.msk.f32.mxu0 %vm286_vm3, %v2047_v53  ;;  %3435 = vmatprep.mubr.msk.f32.mxu1 %vm286_vm3, %v2047_v53 }
 0xa3d   :  { %3419 = vmatmul.mubr.msk.f32.vlgmr.msra.gmra.mrb[12].mxu0 %vm286_vm3, %v2048_v54  ;;  %3436 = vmatmul.mubr.msk.f32.vlgmr.msra.gmra.mrb[12].mxu1 %vm286_vm3, %v2048_v54 }
 0xa3e   :  { %3533 = vmatpush3.bf16.msra.mxu0 %v3530_v45  ;;  %3447 = vmatprep.mubr.msk.f32.mxu0 %vm116_vm2, %v3826_v23 }
 0xa3f   :  { %3535 = vmatprep.subr.bf16.mxu0 %v3534_v55  ;;  %3439 = vmatpush3.msra.mxu1 %v2519_v46 }
 0xa40   :  { %3543 = vmatprep.subr.bf16.mxu1 %v3542_v3 }
 0xa41   :  { %3448 = vmatmul.mubr.msk.f32.vlgmr.msra.gmra.mrb[14].mxu0 %vm116_vm2, %v3829_v24 }
 0xa42   :  { %3454 = vmatprep.mubr.msk.f32.mxu0 %vm116_vm2, %v3750_v51  ;;  %3537 = vmatpush3.bf16.msra.mxu0 %v3534_v55 }
 0xa43   :  { %3539 = vmatprep.subr.bf16.mxu0 %v3538_v58 }
 0xa49   :  { %3455 = vmatmul.mubr.msk.f32.vlgmr.msra.gmra.mrb[14].mxu0 %vm116_vm2, %v3753_v52 }
 0xa4a   :  { %3541 = vmatpush3.bf16.msra.mxu0 %v3538_v58 }
 0xa4b   :  { %3547 = vmatprep.subr.bf16.mxu0 %v3546_v13 }
 0xb10   :  { %v3420_v59 = vpop.f32.mrb[12].mxu0 }
 0xb11   :  { %v2275_v60 = vpop.f32.mrb[13].mxu0  ;;  %v2287_v62 = vmax.f32 %v3420_v59, 0.0 }
 0xb12   :  { %v2286_v61 = vmax.f32 %v2275_v60, 0.0 }
 0xb14   :  { %3440 = vmatprep.mubr.msk.f32.mxu1 %vm286_vm3, %v2286_v61 }
 0xb15   :  { %3441 = vmatmul.mubr.msk.f32.vlgmr.msra.gmra.mrb[12].mxu1 %vm286_vm3, %v2287_v62 }
 0xb16   :  { %3545 = vmatpush3.bf16.msra.mxu1 %v3542_v3 }
 0xbe8   :  { %v3442_v51 = vpop.f32.mrb[12].mxu1 }
 0xbe9   :  { %v2592_v52 = vpop.f32.mrb[13].mxu1  ;;  %v2604_v0 = vadd.f32 %v3442_v51, %v3829_v24 }
 0xbea   :  { %v2603_v63 = vadd.f32 %v2592_v52, %v3826_v23 }
 0xbec   :  { %3461 = vmatprep.mubr.msk.f32.mxu0 %vm116_vm2, %v2603_v63 }
 0xbed   :  { %3462 = vmatmul.mubr.msk.f32.vlgmr.msra.gmra.mrb[14].mxu0 %vm116_vm2, %v2604_v0 }
 0xbee   :  { %3549 = vmatpush3.bf16.msra.mxu0 %v3546_v13 }
 0xcc0   :  { %v3463_v5 = vpop.f32.mrb[14].mxu0 }
 0xcc1   :  { %v2833_v6 = vpop.f32.mrb[15].mxu0  ;;  %v2850_v8 = vadd.f32 %v3463_v5, %v3121_v4 }
 0xcc2   :  { %v2849_v7 = vadd.f32 %v3121_v4, %v2833_v6 }
 0xcc4   :  { %3468 = vmatprep.mubr.msk.f32.mxu1 %vm116_vm2, %v2849_v7 }
 0xcc5   :  { %3469 = vmatmul.mubr.msk.f32.vlgmr.msra.gmra.mrb[14].mxu1 %vm116_vm2, %v2850_v8 }
 0xd98   :  { %v3470_v15 = vpop.f32.mrb[14].mxu1 }
 0xd99   :  { %v2936_v16 = vadd.f32 %v3470_v15, %v3122_v14  ;;  %v2930_v17 = vpop.f32.mrb[15].mxu1 }
 0xd9a   :  { %v2931_v18 = vadd.f32 %v3122_v14, %v2930_v17 }
 0xd9b   :  { %v2940_v20 = vadd.f32 %v2936_v16, %v3660_v10 }
 0xd9c   :  { %v2939_v19 = vadd.f32 %v2931_v18, %v3658_v9 }
 0xd9e   :  { %3475 = vmatprep.mubr.msk.f32.mxu0 %vm116_vm2, %v2939_v19 }
 0xd9f   :  { %3476 = vmatmul.mubr.msk.f32.vlgmr.msra.gmra.mrb[16].mxu0 %vm116_vm2, %v2940_v20 }
 0xe72   :  { %v3477_v22 = vpop.f32.mrb[16].mxu0 }
 0xe73   :  { %v3026_v23 = vadd.f32 %v3477_v22, %v3125_v21  ;;  %v3020_v24 = vpop.f32.mrb[17].mxu0 }
 0xe74   :  { %v3021_v25 = vadd.f32 %v3125_v21, %v3020_v24 }
 0xe75   :  { %3031 = vst.msk [vmem:[#allocation2 + $0x8] sm:$0xff] %vm3029_vm4, %v3026_v23 }
 0xe76   :  { %3030 = vst.msk [vmem:[#allocation2] sm:$0xff] %vm3029_vm4, %v3021_v25 }
 0xe77   :  { %3604 = shalt.err (!%p3601_p4)
}
 0xe78   :  { %s3605_s2 = scalar_lea.hbm %s3967_s3, 256 }
 0xe79   :  { %p3606_p5 = scmp.ne.s32.totalorder %s3967_s3, %s3605_s2  ;;  %p3609_p6 = scmp.lt.u32.totalorder %s3605_s2, %s3967_s3 }
 0xe7b   :  { %p3611_p7 = pnand %p3609_p6, %p3606_p5 }
 0xe7d   :  { %3614 = shalt.err (!%p3611_p7)
}
 0xe7e   :  { %s3618_s4 = smov 128   ;;  %s3619_s5 = smov 8  }
 0xe7f   :  { %3043 = dma.vmem_to_hbm [thread:$0]  %s3038_s0, 256, %s3967_s3, [#allocation3], %s3618_s4, %s3618_s4, %s3619_s5  }
 0xe80   :  { %3615 = dma.done.wait [#allocation3], 256  }
 0xe81   :  { %3616 = vsyncadd [#allocation3], 4294967040 }
 0xe82   :  { %3047 = vsyncpa [#allocation3], 1 }

</bundles_post_ra>
